<compile_context>
chip_gen: v7x
topology: tpu7x:2x2x1
jax: 0.10.0
libtpu: 0.0.40
codegen_flags: <defaults>
</compile_context>

<pallas_src>
import jax
import jax.numpy as jnp
from jax.experimental import pallas as pl
from jax.experimental.pallas import tpu as pltpu

K_FEATURES = 50176          # 1 * 224 * 224, fixed by nn.Linear(50176, 1)
K_LANE = 128                # lane (fast) axis width
K_SUB = K_FEATURES // K_LANE  # 392 sublane-axis rows


def _classifier_kernel(x_ref, w_ref, b_ref, o_ref):
    # x_ref: (B, 392, 128) f32 in VMEM (dense sublane/lane tiles)
    # w_ref: (392, 128)    f32 in VMEM
    # b_ref: (1, 1)        f32 in SMEM (scalar bias)
    # o_ref: (B, 1)        f32 in VMEM
    x = x_ref[...]
    w = w_ref[...]
    prod = x * w                                   # VPU, broadcast over batch
    partial = jnp.sum(prod, axis=-1)               # lane reduce   -> (B, 392)
    logits = jnp.sum(partial, axis=-1, keepdims=True)  # sublane reduce -> (B, 1)
    logits = logits + b_ref[0, 0]
    o_ref[...] = jax.nn.sigmoid(logits).astype(o_ref.dtype)


def simple_classifier_forward(x, weight, bias):
    """x: (B, C, H, W) f32; weight: (1, K) f32; bias: (1,) f32 -> (B, 1) f32."""
    B = x.shape[0]
    x_flat = x.reshape(B, -1)                      # torch.flatten(x, 1)
    K = x_flat.shape[1]
    assert K == K_FEATURES

    # Zero-copy, lane-dense tilings of the same row-major data.
    x_tiles = x_flat.reshape(B, K_SUB, K_LANE)     # (B, 392, 128)
    w_tiles = weight.reshape(K_SUB, K_LANE)        # (392, 128)
    b_2d = bias.reshape(1, 1)                      # scalar for SMEM

    cost = pl.CostEstimate(
        flops=2 * B * K,
        transcendentals=B,
        bytes_accessed=4 * (B * K + K + B),
    )

    return pl.pallas_call(
        _classifier_kernel,
        out_shape=jax.ShapeDtypeStruct((B, 1), jnp.float32),
        in_specs=[
            pl.BlockSpec(memory_space=pltpu.MemorySpace.VMEM),   # x tiles
            pl.BlockSpec(memory_space=pltpu.MemorySpace.VMEM),   # weight tiles
            pl.BlockSpec(memory_space=pltpu.MemorySpace.SMEM),   # bias scalar
        ],
        out_specs=pl.BlockSpec(memory_space=pltpu.MemorySpace.VMEM),
        cost_estimate=cost,
    )(x_tiles, w_tiles, b_2d)


if __name__ == "__main__":
    key = jax.random.PRNGKey(0)
    kx, kw, kb = jax.random.split(key, 3)

    # Input consistent with Linear(50176, 1): (B=2, C=1, H=224, W=224)
    B, C, H, W = 2, 1, 224, 224
    x = jax.random.normal(kx, (B, C, H, W), dtype=jnp.float32)

    # Deterministic parameter init mimicking nn.Linear: U(-1/sqrt(K), 1/sqrt(K))
    bound = 1.0 / jnp.sqrt(jnp.float32(K_FEATURES))
    weight = jax.random.uniform(
        kw, (1, K_FEATURES), dtype=jnp.float32, minval=-bound, maxval=bound
    )
    bias = jax.random.uniform(
        kb, (1,), dtype=jnp.float32, minval=-bound, maxval=bound
    )

    out = jax.block_until_ready(simple_classifier_forward(x, weight, bias))

    # Reference check (plain JAX)
    ref = jax.nn.sigmoid(x.reshape(B, -1) @ weight.T + bias)
    assert out.shape == (B, 1)
    assert jnp.allclose(out, ref, atol=1e-5, rtol=1e-5)

    print("KERNEL_OK")
</pallas_src>

<mosaic_0001>
module attributes {stable_mosaic.version = 11 : i64} {
  func.func @_classifier_kernel(%arg0: memref<2x392x128xf32, #tpu.memory_space<vmem>>, %arg1: memref<392x128xf32, #tpu.memory_space<vmem>>, %arg2: memref<1x1xf32, #tpu.memory_space<smem>>, %arg3: memref<2x1xf32, #tpu.memory_space<vmem>>) attributes {dimension_semantics = [], scalar_prefetch = 0 : i64, scratch_operands = 0 : i64, tpu.core_type = #tpu.core_type<tc>} {
    %c0 = arith.constant 0 : index
    %c0_0 = arith.constant 0 : index
    %c0_1 = arith.constant 0 : index
    %0 = vector.load %arg0[%c0, %c0_0, %c0_1] : memref<2x392x128xf32, #tpu.memory_space<vmem>>, vector<2x392x128xf32>
    %c0_2 = arith.constant 0 : index
    %c0_3 = arith.constant 0 : index
    %1 = vector.load %arg1[%c0_2, %c0_3] : memref<392x128xf32, #tpu.memory_space<vmem>>, vector<392x128xf32>
    %2 = vector.shape_cast %1 : vector<392x128xf32> to vector<1x392x128xf32>
    %3 = vector.broadcast %2 : vector<1x392x128xf32> to vector<2x392x128xf32>
    %4 = arith.mulf %0, %3 : vector<2x392x128xf32>
    %cst = arith.constant dense<0.000000e+00> : vector<2x392xf32>
    %5 = vector.multi_reduction <add>, %4, %cst [2] : vector<2x392x128xf32> to vector<2x392xf32>
    %cst_4 = arith.constant dense<0.000000e+00> : vector<2xf32>
    %6 = vector.multi_reduction <add>, %5, %cst_4 [1] : vector<2x392xf32> to vector<2xf32>
    %7 = vector.shape_cast %6 : vector<2xf32> to vector<2x1xf32>
    %c0_5 = arith.constant 0 : index
    %c0_6 = arith.constant 0 : index
    %8 = memref.load %arg2[%c0_5, %c0_6] : memref<1x1xf32, #tpu.memory_space<smem>>
    %9 = vector.broadcast %8 : f32 to vector<2x1xf32>
    %10 = arith.addf %7, %9 : vector<2x1xf32>
    %11 = arith.negf %10 : vector<2x1xf32>
    %12 = math.exp %11 : vector<2x1xf32>
    %cst_7 = arith.constant 1.000000e+00 : f32
    %13 = vector.broadcast %cst_7 : f32 to vector<2x1xf32>
    %14 = arith.addf %13, %12 : vector<2x1xf32>
    %15 = arith.divf %13, %14 : vector<2x1xf32>
    %c0_8 = arith.constant 0 : index
    %c0_9 = arith.constant 0 : index
    %16 = vector.load %arg3[%c0_8, %c0_9] : memref<2x1xf32, #tpu.memory_space<vmem>>, vector<2x1xf32>
    tpu.vector_store %arg3[%c0_8, %c0_9], %15 {strides = array<i32>} : memref<2x1xf32, #tpu.memory_space<vmem>>, vector<2x1xf32>,
    return
  }
}

</mosaic_0001>

<bundles_post_ra>
// kernel: tpu_custom_call.1
= control target key start
LH: loop header
LB: loop body
LE: loop exit
PB: predicated region body
PF: predicated region fallthrough
CT: control target
= control target key end

     0   :  { %9 = vsyncpa [#allocation4], 0  ;;  %s1570_s0 = inlined_call_operand.hbm [shape: f32[2,392,128], index: 0, kind: input, shape index: {}]   ;;  %s1571_s1 = inlined_call_operand.hbm [shape: f32[392,128], index: 1, kind: input, shape index: {}]   ;;  %s1572_s2 = inlined_call_operand.<no memory space> [shape: f32[1,1], index: 2, kind: input, shape index: {}]   ;;  %s1573_s3 = inlined_call_operand.vmem [shape: f32[2,1], index: 3, kind: output, shape index: {}]  }
   0x1   :  { %10 = vsyncpa [#allocation6], 0  ;;  %s1190_s12 = smov [#allocation3]   ;;  %s1142_s16 = scalar_lea.hbm %s1570_s0, 12544 }
   0x2   :  { %s16_s13 = sshll.u32 %s1190_s12, 4  ;;  %p1143_p0 = scmp.ne.s32.totalorder %s1570_s0, %s1142_s16  ;;  %s17_s13 = int_to_ptr.vmem [resolvable:$true] %s16_s13 }
   0x3   :  { %p1146_p1 = scmp.lt.u32.totalorder %s1142_s16, %s1570_s0 }
   0x5   :  { %p1148_p2 = pnand %p1146_p1, %p1143_p0 }
   0x7   :  { %1151 = shalt.err (!%p1148_p2)
}
   0x8   :  { %s1152_s21 = scalar_lea.vmem %s17_s13, 12544  ;;  %p1157_p4 = scmp.lt.s32.totalorder %s17_s13, %s17_s13 }
   0x9   :  { %p1153_p3 = scmp.ne.s32.totalorder %s17_s13, %s1152_s21  ;;  %p1158_p5 = scmp.lt.s32.totalorder %s1152_s21, %s1152_s21 }
   0xb   :  { %p1159_p6 = por %p1158_p5, %p1157_p4 }
   0xd   :  { %p1160_p7 = pnand %p1159_p6, %p1153_p3 }
   0xf   :  { %1163 = shalt.err (!%p1160_p7)
}
  0x10   :  { %s1191_s22 = smov 128   ;;  %s1192_s23 = smov 8  }
  0x11   :  { %22 = dma.hbm_to_vmem [thread:$0]  %s1570_s0, 12544, %s17_s13, [#allocation4], %s1191_s22, %s1191_s22, %s1192_s23  }
  0x12   :  { %s1193_s26 = smov [#allocation5]   ;;  %s1164_s30 = scalar_lea.hbm %s1571_s1, 6272 }
  0x13   :  { %s28_s27 = sshll.u32 %s1193_s26, 4  ;;  %p1165_p8 = scmp.ne.s32.totalorder %s1571_s1, %s1164_s30  ;;  %s29_s27 = int_to_ptr.vmem [resolvable:$true] %s28_s27 }
  0x14   :  { %p1168_p9 = scmp.lt.u32.totalorder %s1164_s30, %s1571_s1 }
  0x16   :  { %p1170_p10 = pnand %p1168_p9, %p1165_p8 }
  0x18   :  { %1173 = shalt.err (!%p1170_p10)
}
  0x19   :  { %s1174_s8 = scalar_lea.vmem %s29_s27, 6272  ;;  %p1179_p12 = scmp.lt.s32.totalorder %s29_s27, %s29_s27 }
  0x1a   :  { %p1175_p11 = scmp.ne.s32.totalorder %s29_s27, %s1174_s8  ;;  %p1180_p13 = scmp.lt.s32.totalorder %s1174_s8, %s1174_s8 }
  0x1c   :  { %p1181_p0 = por %p1180_p13, %p1179_p12 }
  0x1e   :  { %p1182_p1 = pnand %p1181_p0, %p1175_p11 }
  0x20   :  { %1185 = shalt.err (!%p1182_p1)
}
  0x21   :  { %34 = dma.hbm_to_vmem [thread:$0]  %s1571_s1, 6272, %s29_s27, [#allocation6], %s1191_s22, %s1191_s22, %s1192_s23  }
  0x22   :  { %1186 = dma.done.wait [#allocation4], 12544  }
  0x23   :  { %1187 = vsyncadd [#allocation4], 4294954752 }
  0x24   :  { %1188 = dma.done.wait [#allocation6], 6272  }
  0x25   :  { %1189 = vsyncadd [#allocation6], 4294961024  ;;  %v59_v0 = vld [vmem:[#allocation3 + $0x80] sm:$0xff]  ;;  %v157_v1 = vld [vmem:[#allocation5 + $0x80] sm:$0xff]  ;;  %vm593_vm0 = vcmask 130112   ;;  %vm600_vm1 = vcmask 195712  }
  0x26   :  { %v43_v2 = vld [vmem:[#allocation3] sm:$0xff]  ;;  %v206_v3 = vmul.f32 %v157_v1, %v59_v0  ;;  %v141_v4 = vld [vmem:[#allocation5] sm:$0xff]  ;;  %v60_v5 = vld [vmem:[#allocation3 + $0x88] sm:$0xff]  ;;  %vm607_vm2 = vcmask 261312   ;;  %vm614_vm3 = vcmask 326912   ;;  %vm621_vm4 = vcmask 392512  }
  0x27   :  { %v158_v6 = vld [vmem:[#allocation5 + $0x88] sm:$0xff]  ;;  %v190_v7 = vmul.f32 %v141_v4, %v43_v2  ;;  %v44_v8 = vld [vmem:[#allocation3 + $0x8] sm:$0xff]  ;;  %v93_v12 = vld [vmem:[#allocation3 + $0x190] sm:$0xff]  ;;  %vm628_vm5 = vcmask 458112   ;;  %vm635_vm6 = vcmask 523712   ;;  %vm642_vm7 = vcmask 589312  }
  0x28   :  { %v142_v9 = vld [vmem:[#allocation5 + $0x8] sm:$0xff]  ;;  %320 = vadd.xlane.f32.xlu1 %v206_v3  ;;  %v207_v10 = vmul.f32 %v158_v6, %v60_v5  ;;  %v92_v13 = vld [vmem:[#allocation3 + $0x188] sm:$0xff]  ;;  %v109_v16 = vld [vmem:[#allocation3 + $0x210] sm:$0xff]  ;;  %vm649_vm8 = vcmask 654912   ;;  %vm656_vm9 = vcmask 720512   ;;  %vm663_vm10 = vcmask 786112  }
  0x29   :  { %288 = vadd.xlane.f32.xlu0 %v190_v7  ;;  %v191_v11 = vmul.f32 %v142_v9, %v44_v8  ;;  %v240_v14 = vmul.f32 %v142_v9, %v93_v12  ;;  %v239_v15 = vmul.f32 %v141_v4, %v92_v13  ;;  %v108_v17 = vld [vmem:[#allocation3 + $0x208] sm:$0xff]  ;;  %v256_v18 = vmul.f32 %v158_v6, %v109_v16  ;;  %v61_v20 = vld [vmem:[#allocation3 + $0x90] sm:$0xff]  ;;  %v159_v21 = vld [vmem:[#allocation5 + $0x90] sm:$0xff] }
  0x2a   :  { %v255_v19 = vmul.f32 %v157_v1, %v108_v17  ;;  %v45_v22 = vld [vmem:[#allocation3 + $0x10] sm:$0xff]  ;;  %v143_v23 = vld [vmem:[#allocation5 + $0x10] sm:$0xff]  ;;  %v208_v24 = vmul.f32 %v159_v21, %v61_v20  ;;  %v110_v26 = vld [vmem:[#allocation3 + $0x218] sm:$0xff]  ;;  %vm670_vm11 = vcmask 851712   ;;  %vm677_vm12 = vcmask 917312  }
  0x2b   :  { %v192_v25 = vmul.f32 %v143_v23, %v45_v22  ;;  %v94_v27 = vld [vmem:[#allocation3 + $0x198] sm:$0xff]  ;;  %v257_v28 = vmul.f32 %v159_v21, %v110_v26  ;;  %v160_v31 = vld [vmem:[#allocation5 + $0x98] sm:$0xff]  ;;  %v75_v38 = vld [vmem:[#allocation3 + $0x100] sm:$0xff]  ;;  %vm684_vm13 = vcmask 982912   ;;  %vm691_vm14 = vcmask 1048512  }
  0x2c   :  { %322 = vadd.xlane.f32.xlu1 %v207_v10  ;;  %v241_v29 = vmul.f32 %v143_v23, %v94_v27  ;;  %v62_v30 = vld [vmem:[#allocation3 + $0x98] sm:$0xff]  ;;  %v144_v33 = vld [vmem:[#allocation5 + $0x18] sm:$0xff]  ;;  %v173_v39 = vld [vmem:[#allocation5 + $0x100] sm:$0xff]  ;;  %vm1096_vm15 = vcmask 1041409  }
  0x2d   :  { %290 = vadd.xlane.f32.xlu0 %v191_v11  ;;  %v46_v32 = vld [vmem:[#allocation3 + $0x18] sm:$0xff]  ;;  %v209_v34 = vmul.f32 %v160_v31, %v62_v30  ;;  %v76_v36 = vld [vmem:[#allocation3 + $0x108] sm:$0xff]  ;;  %v222_v41 = vmul.f32 %v173_v39, %v75_v38  ;;  %v111_v42 = vld [vmem:[#allocation3 + $0x220] sm:$0xff] }
  0x2e   :  { %v193_v35 = vmul.f32 %v144_v33, %v46_v32  ;;  %v174_v37 = vld [vmem:[#allocation5 + $0x108] sm:$0xff]  ;;  %v95_v43 = vld [vmem:[#allocation3 + $0x1a0] sm:$0xff]  ;;  %v258_v44 = vmul.f32 %v160_v31, %v111_v42  ;;  %v125_v46 = vld [vmem:[#allocation3 + $0x290] sm:$0xff] }
  0x2f   :  { %v223_v40 = vmul.f32 %v174_v37, %v76_v36  ;;  %v242_v45 = vmul.f32 %v144_v33, %v95_v43  ;;  %v124_v47 = vld [vmem:[#allocation3 + $0x288] sm:$0xff]  ;;  %v272_v48 = vmul.f32 %v174_v37, %v125_v46  ;;  %v63_v50 = vld [vmem:[#allocation3 + $0xa0] sm:$0xff]  ;;  %v161_v51 = vld [vmem:[#allocation5 + $0xa0] sm:$0xff] }
  0x30   :  { %388 = vadd.xlane.f32.xlu1 %v240_v14  ;;  %v271_v49 = vmul.f32 %v173_v39, %v124_v47  ;;  %v47_v52 = vld [vmem:[#allocation3 + $0x20] sm:$0xff]  ;;  %v145_v53 = vld [vmem:[#allocation5 + $0x20] sm:$0xff]  ;;  %v210_v54 = vmul.f32 %v161_v51, %v63_v50  ;;  %v96_v56 = vld [vmem:[#allocation3 + $0x1a8] sm:$0xff] }
  0x31   :  { %386 = vadd.xlane.f32.xlu0 %v239_v15  ;;  %v194_v55 = vmul.f32 %v145_v53, %v47_v52  ;;  %v77_v57 = vld [vmem:[#allocation3 + $0x110] sm:$0xff]  ;;  %v175_v58 = vld [vmem:[#allocation5 + $0x110] sm:$0xff]  ;;  %v243_v59 = vmul.f32 %v145_v53, %v96_v56  ;;  %v126_v61 = vld [vmem:[#allocation3 + $0x298] sm:$0xff] }
  0x32   :  { %v224_v60 = vmul.f32 %v175_v58, %v77_v57  ;;  %v112_v62 = vld [vmem:[#allocation3 + $0x228] sm:$0xff]  ;;  %v273_v63 = vmul.f32 %v175_v58, %v126_v61  ;;  %v162_v2 = vld [vmem:[#allocation5 + $0xa8] sm:$0xff]  ;;  %v97_v7 = vld [vmem:[#allocation3 + $0x1b0] sm:$0xff] }
  0x33   :  { %v259_v0 = vmul.f32 %v161_v51, %v112_v62  ;;  %v64_v1 = vld [vmem:[#allocation3 + $0xa8] sm:$0xff]  ;;  %v146_v4 = vld [vmem:[#allocation5 + $0x28] sm:$0xff]  ;;  %v127_v12 = vld [vmem:[#allocation3 + $0x2a0] sm:$0xff] }
  0x34   :  { %420 = vadd.xlane.f32.xlu1 %v256_v18  ;;  %v48_v3 = vld [vmem:[#allocation3 + $0x28] sm:$0xff]  ;;  %v211_v5 = vmul.f32 %v162_v2, %v64_v1  ;;  %v78_v8 = vld [vmem:[#allocation3 + $0x118] sm:$0xff]  ;;  %v244_v10 = vmul.f32 %v146_v4, %v97_v7  ;;  %v113_v13 = vld [vmem:[#allocation3 + $0x230] sm:$0xff] }
  0x35   :  { %418 = vadd.xlane.f32.xlu0 %v255_v19  ;;  %v195_v6 = vmul.f32 %v146_v4, %v48_v3  ;;  %v176_v9 = vld [vmem:[#allocation5 + $0x118] sm:$0xff]  ;;  %v260_v15 = vmul.f32 %v162_v2, %v113_v13  ;;  %v65_v16 = vld [vmem:[#allocation3 + $0xb0] sm:$0xff]  ;;  %v163_v17 = vld [vmem:[#allocation5 + $0xb0] sm:$0xff] }
  0x36   :  { %v225_v11 = vmul.f32 %v176_v9, %v78_v8  ;;  %v274_v14 = vmul.f32 %v176_v9, %v127_v12  ;;  %v49_v18 = vld [vmem:[#allocation3 + $0x30] sm:$0xff]  ;;  %v147_v19 = vld [vmem:[#allocation5 + $0x30] sm:$0xff]  ;;  %v212_v20 = vmul.f32 %v163_v17, %v65_v16  ;;  %v98_v22 = vld [vmem:[#allocation3 + $0x1b8] sm:$0xff] }
  0x37   :  { %v196_v21 = vmul.f32 %v147_v19, %v49_v18  ;;  %v79_v23 = vld [vmem:[#allocation3 + $0x120] sm:$0xff]  ;;  %v128_v27 = vld [vmem:[#allocation3 + $0x2a8] sm:$0xff]  ;;  %v66_v31 = vld [vmem:[#allocation3 + $0xb8] sm:$0xff] }
  0x38   :  { %324 = vadd.xlane.f32.xlu1 %v208_v24  ;;  %v177_v24 = vld [vmem:[#allocation5 + $0x120] sm:$0xff]  ;;  %v164_v32 = vld [vmem:[#allocation5 + $0xb8] sm:$0xff]  ;;  %v50_v33 = vld [vmem:[#allocation3 + $0x38] sm:$0xff] }
  0x39   :  { %292 = vadd.xlane.f32.xlu0 %v192_v25  ;;  %v245_v25 = vmul.f32 %v147_v19, %v98_v22  ;;  %v226_v26 = vmul.f32 %v177_v24, %v79_v23  ;;  %v99_v37 = vld [vmem:[#allocation3 + $0x1c0] sm:$0xff]  ;;  %v80_v38 = vld [vmem:[#allocation3 + $0x128] sm:$0xff]  ;;  %v178_v39 = vld [vmem:[#allocation5 + $0x128] sm:$0xff] }
  0x3a   :  { %v129_v42 = vld [vmem:[#allocation3 + $0x2b0] sm:$0xff]  ;;  %v115_v43 = vld [vmem:[#allocation3 + $0x240] sm:$0xff]  ;;  %v100_v52 = vld [vmem:[#allocation3 + $0x1c8] sm:$0xff] }
  0x3b   :  { %v67_v46 = vld [vmem:[#allocation3 + $0xc0] sm:$0xff]  ;;  %v165_v47 = vld [vmem:[#allocation5 + $0xc0] sm:$0xff]  ;;  %v130_v57 = vld [vmem:[#allocation3 + $0x2b8] sm:$0xff] }
  0x3c   :  { %422 = vadd.xlane.f32.xlu1 %v257_v28  ;;  %v114_v28 = vld [vmem:[#allocation3 + $0x238] sm:$0xff]  ;;  %v214_v50 = vmul.f32 %v165_v47, %v67_v46  ;;  %v81_v53 = vld [vmem:[#allocation3 + $0x130] sm:$0xff]  ;;  %v116_v58 = vld [vmem:[#allocation3 + $0x248] sm:$0xff] }
  0x3d   :  { %390 = vadd.xlane.f32.xlu0 %v241_v29  ;;  %v275_v29 = vmul.f32 %v177_v24, %v128_v27  ;;  %v261_v30 = vmul.f32 %v163_v17, %v114_v28  ;;  %v68_v61 = vld [vmem:[#allocation3 + $0xc8] sm:$0xff]  ;;  %v166_v62 = vld [vmem:[#allocation5 + $0xc8] sm:$0xff]  ;;  %v101_v3 = vld [vmem:[#allocation3 + $0x1d0] sm:$0xff] }
  0x3e   :  { %v215_v1 = vmul.f32 %v166_v62, %v68_v61  ;;  %v82_v4 = vld [vmem:[#allocation3 + $0x138] sm:$0xff]  ;;  %v131_v8 = vld [vmem:[#allocation3 + $0x2c0] sm:$0xff]  ;;  %v117_v9 = vld [vmem:[#allocation3 + $0x250] sm:$0xff] }
  0x3f   :  { %v69_v12 = vld [vmem:[#allocation3 + $0xd0] sm:$0xff]  ;;  %v167_v13 = vld [vmem:[#allocation5 + $0xd0] sm:$0xff]  ;;  %v102_v18 = vld [vmem:[#allocation3 + $0x1d8] sm:$0xff] }
  0x40   :  { %326 = vadd.xlane.f32.xlu1 %v209_v34  ;;  %v148_v34 = vld [vmem:[#allocation5 + $0x38] sm:$0xff]  ;;  %v216_v16 = vmul.f32 %v167_v13, %v69_v12  ;;  %v83_v19 = vld [vmem:[#allocation3 + $0x140] sm:$0xff]  ;;  %v118_v24 = vld [vmem:[#allocation3 + $0x258] sm:$0xff] }
  0x41   :  { %294 = vadd.xlane.f32.xlu0 %v193_v35  ;;  %v213_v35 = vmul.f32 %v164_v32, %v66_v31  ;;  %v197_v36 = vmul.f32 %v148_v34, %v50_v33  ;;  %v132_v23 = vld [vmem:[#allocation3 + $0x2c8] sm:$0xff]  ;;  %v70_v27 = vld [vmem:[#allocation3 + $0xd8] sm:$0xff]  ;;  %v103_v33 = vld [vmem:[#allocation3 + $0x1e0] sm:$0xff] }
  0x42   :  { %v168_v28 = vld [vmem:[#allocation5 + $0xd8] sm:$0xff]  ;;  %v86_v12 = vld [vmem:[#allocation3 + $0x158] sm:$0xff] }
  0x43   :  { %v217_v31 = vmul.f32 %v168_v28, %v70_v27 }
  0x44   :  { %354 = vadd.xlane.f32.xlu1 %v223_v40  ;;  %v246_v40 = vmul.f32 %v148_v34, %v99_v37  ;;  %v84_v34 = vld [vmem:[#allocation3 + $0x148] sm:$0xff] }
  0x45   :  { %352 = vadd.xlane.f32.xlu0 %v222_v41  ;;  %v227_v41 = vmul.f32 %v178_v39, %v80_v38  ;;  %v133_v38 = vld [vmem:[#allocation3 + $0x2d0] sm:$0xff] }
  0x48   :  { %424 = vadd.xlane.f32.xlu1 %v258_v44  ;;  %v276_v44 = vmul.f32 %v178_v39, %v129_v42  ;;  %v119_v39 = vld [vmem:[#allocation3 + $0x260] sm:$0xff] }
  0x49   :  { %392 = vadd.xlane.f32.xlu0 %v242_v45  ;;  %v262_v45 = vmul.f32 %v164_v32, %v115_v43  ;;  %v71_v42 = vld [vmem:[#allocation3 + $0xe0] sm:$0xff]  ;;  %v169_v43 = vld [vmem:[#allocation5 + $0xe0] sm:$0xff] }
  0x4a   :  { %v218_v46 = vmul.f32 %v169_v43, %v71_v42 }
  0x4c   :  { %452 = vadd.xlane.f32.xlu1 %v272_v48  ;;  %v51_v48 = vld [vmem:[#allocation3 + $0x40] sm:$0xff] }
  0x4d   :  { %450 = vadd.xlane.f32.xlu0 %v271_v49  ;;  %v149_v49 = vld [vmem:[#allocation5 + $0x40] sm:$0xff] }
  0x4e   :  { %v198_v51 = vmul.f32 %v149_v49, %v51_v48 }
  0x50   :  { %328 = vadd.xlane.f32.xlu1 %v210_v54  ;;  %v179_v54 = vld [vmem:[#allocation5 + $0x130] sm:$0xff] }
  0x51   :  { %296 = vadd.xlane.f32.xlu0 %v194_v55  ;;  %v247_v55 = vmul.f32 %v149_v49, %v100_v52  ;;  %v228_v56 = vmul.f32 %v179_v54, %v81_v53  ;;  %v104_v49 = vld [vmem:[#allocation3 + $0x1e8] sm:$0xff] }
  0x54   :  { %394 = vadd.xlane.f32.xlu1 %v243_v59  ;;  %v277_v59 = vmul.f32 %v179_v54, %v130_v57  ;;  %v120_v57 = vld [vmem:[#allocation3 + $0x268] sm:$0xff] }
  0x55   :  { %356 = vadd.xlane.f32.xlu0 %v224_v60  ;;  %v263_v60 = vmul.f32 %v165_v47, %v116_v58  ;;  %v582_v47 = vlaneseq  ;;  %v267_v61 = vmul.f32 %v169_v43, %v120_v57  ;;  %v136_v57 = vld [vmem:[#allocation3 + $0x2e8] sm:$0xff] }
  0x57   :  { %v1238_v53 = vand.u32 127, %v582_v47 }
  0x58   :  { %454 = vadd.xlane.f32.xlu1 %v273_v63  ;;  %v52_v63 = vld [vmem:[#allocation3 + $0x48] sm:$0xff] }
  0x59   :  { %426 = vadd.xlane.f32.xlu0 %v259_v0  ;;  %v150_v0 = vld [vmem:[#allocation5 + $0x48] sm:$0xff]  ;;  %v588_v58 = vadd.s32 4294967288, %v1238_v53 }
  0x5a   :  { %v199_v2 = vmul.f32 %v150_v0, %v52_v63  ;;  %v170_v63 = vld [vmem:[#allocation5 + $0xe8] sm:$0xff] }
  0x5c   :  { %330 = vadd.xlane.f32.xlu1 %v211_v5  ;;  %v180_v5 = vld [vmem:[#allocation5 + $0x138] sm:$0xff] }
  0x5d   :  { %298 = vadd.xlane.f32.xlu0 %v195_v6  ;;  %v248_v6 = vmul.f32 %v150_v0, %v101_v3  ;;  %v229_v7 = vmul.f32 %v180_v5, %v82_v4  ;;  %v56_v3 = vld [vmem:[#allocation3 + $0x68] sm:$0xff]  ;;  %v154_v4 = vld [vmem:[#allocation5 + $0x68] sm:$0xff] }
  0x60   :  { %396 = vadd.xlane.f32.xlu1 %v244_v10  ;;  %v278_v10 = vmul.f32 %v180_v5, %v131_v8  ;;  %v105_v8 = vld [vmem:[#allocation3 + $0x1f0] sm:$0xff] }
  0x61   :  { %358 = vadd.xlane.f32.xlu0 %v225_v11  ;;  %v264_v11 = vmul.f32 %v166_v62, %v117_v9  ;;  %v72_v62 = vld [vmem:[#allocation3 + $0xe8] sm:$0xff] }
  0x62   :  { %v219_v5 = vmul.f32 %v170_v63, %v72_v62 }
  0x64   :  { %456 = vadd.xlane.f32.xlu1 %v274_v14  ;;  %v53_v14 = vld [vmem:[#allocation3 + $0x50] sm:$0xff] }
  0x65   :  { %428 = vadd.xlane.f32.xlu0 %v260_v15  ;;  %v151_v15 = vld [vmem:[#allocation5 + $0x50] sm:$0xff] }
  0x66   :  { %v200_v17 = vmul.f32 %v151_v15, %v53_v14 }
  0x68   :  { %332 = vadd.xlane.f32.xlu1 %v212_v20  ;;  %v181_v20 = vld [vmem:[#allocation5 + $0x140] sm:$0xff] }
  0x69   :  { %300 = vadd.xlane.f32.xlu0 %v196_v21  ;;  %v249_v21 = vmul.f32 %v151_v15, %v102_v18  ;;  %v230_v22 = vmul.f32 %v181_v20, %v83_v19  ;;  %v252_v15 = vmul.f32 %v154_v4, %v105_v8  ;;  %v135_v18 = vld [vmem:[#allocation3 + $0x2e0] sm:$0xff] }
  0x6c   :  { %398 = vadd.xlane.f32.xlu1 %v245_v25  ;;  %v279_v25 = vmul.f32 %v181_v20, %v132_v23 }
  0x6d   :  { %360 = vadd.xlane.f32.xlu0 %v226_v26  ;;  %v265_v26 = vmul.f32 %v167_v13, %v118_v24  ;;  %v184_v13 = vld [vmem:[#allocation5 + $0x158] sm:$0xff] }
  0x6e   :  { %v282_v24 = vmul.f32 %v184_v13, %v135_v18  ;;  %v107_v18 = vld [vmem:[#allocation3 + $0x200] sm:$0xff] }
  0x70   :  { %458 = vadd.xlane.f32.xlu1 %v275_v29  ;;  %v54_v29 = vld [vmem:[#allocation3 + $0x58] sm:$0xff] }
  0x71   :  { %430 = vadd.xlane.f32.xlu0 %v261_v30  ;;  %v152_v30 = vld [vmem:[#allocation5 + $0x58] sm:$0xff] }
  0x72   :  { %v201_v32 = vmul.f32 %v152_v30, %v54_v29  ;;  %v171_v29 = vld [vmem:[#allocation5 + $0xf0] sm:$0xff] }
  0x74   :  { %334 = vadd.xlane.f32.xlu1 %v213_v35  ;;  %v182_v35 = vld [vmem:[#allocation5 + $0x148] sm:$0xff] }
  0x75   :  { %302 = vadd.xlane.f32.xlu0 %v197_v36  ;;  %v250_v36 = vmul.f32 %v152_v30, %v103_v33  ;;  %v231_v37 = vmul.f32 %v182_v35, %v84_v34  ;;  %v57_v33 = vld [vmem:[#allocation3 + $0x70] sm:$0xff]  ;;  %v155_v34 = vld [vmem:[#allocation5 + $0x70] sm:$0xff] }
  0x78   :  { %400 = vadd.xlane.f32.xlu1 %v246_v40  ;;  %v280_v40 = vmul.f32 %v182_v35, %v133_v38 }
  0x79   :  { %362 = vadd.xlane.f32.xlu0 %v227_v41  ;;  %v266_v41 = vmul.f32 %v168_v28, %v119_v39  ;;  %v73_v28 = vld [vmem:[#allocation3 + $0xf0] sm:$0xff] }
  0x7c   :  { %460 = vadd.xlane.f32.xlu1 %v276_v44  ;;  %v55_v44 = vld [vmem:[#allocation3 + $0x60] sm:$0xff] }
  0x7d   :  { %432 = vadd.xlane.f32.xlu0 %v262_v45  ;;  %v153_v45 = vld [vmem:[#allocation5 + $0x60] sm:$0xff] }
  0x7e   :  { %v202_v48 = vmul.f32 %v153_v45, %v55_v44  ;;  %v251_v52 = vmul.f32 %v153_v45, %v104_v49  ;;  %v87_v45 = vld [vmem:[#allocation3 + $0x160] sm:$0xff] }
  0x80   :  { %336 = vadd.xlane.f32.xlu1 %v214_v50  ;;  %v85_v50 = vld [vmem:[#allocation3 + $0x150] sm:$0xff] }
  0x81   :  { %304 = vadd.xlane.f32.xlu0 %v198_v51  ;;  %v183_v51 = vld [vmem:[#allocation5 + $0x150] sm:$0xff] }
  0x82   :  { %v232_v54 = vmul.f32 %v183_v51, %v85_v50 }
  0x84   :  { %402 = vadd.xlane.f32.xlu1 %v247_v55  ;;  %v134_v55 = vld [vmem:[#allocation3 + $0x2d8] sm:$0xff] }
  0x85   :  { %364 = vadd.xlane.f32.xlu0 %v228_v56  ;;  %v1240_v56 = vshrl.u32 %v582_v47, 7  ;;  %v602_v47 = vadd.s32 4294967272, %v1238_v53 }
  0x87   :  { %v1245_v0 = vsub.s32 %v1238_v53, %v1240_v56 }
  0x88   :  { %462 = vadd.xlane.f32.xlu1 %v277_v59  ;;  %v281_v59 = vmul.f32 %v183_v51, %v134_v55 }
  0x89   :  { %434 = vadd.xlane.f32.xlu0 %v263_v60 }
  0x8c   :  { %338 = vadd.xlane.f32.xlu1 %v215_v1 }
  0x8d   :  { %306 = vadd.xlane.f32.xlu0 %v199_v2  ;;  %v1248_v2 = vsub.s32 %v588_v58, %v1240_v56 }
  0x90   :  { %404 = vadd.xlane.f32.xlu1 %v248_v6 }
  0x91   :  { %366 = vadd.xlane.f32.xlu0 %v229_v7  ;;  %v203_v7 = vmul.f32 %v154_v4, %v56_v3 }
  0x94   :  { %464 = vadd.xlane.f32.xlu1 %v278_v10 }
  0x95   :  { %436 = vadd.xlane.f32.xlu0 %v264_v11 }
  0x98   :  { %340 = vadd.xlane.f32.xlu1 %v216_v16 }
  0x99   :  { %308 = vadd.xlane.f32.xlu0 %v200_v17  ;;  %v233_v17 = vmul.f32 %v184_v13, %v86_v12 }
  0x9c   :  { %406 = vadd.xlane.f32.xlu1 %v249_v21  ;;  %v121_v21 = vld [vmem:[#allocation3 + $0x270] sm:$0xff] }
  0x9d   :  { %368 = vadd.xlane.f32.xlu0 %v230_v22  ;;  %v595_v22 = vadd.s32 4294967280, %v1238_v53  ;;  %v268_v27 = vmul.f32 %v170_v63, %v121_v21  ;;  %v88_v21 = vld [vmem:[#allocation3 + $0x168] sm:$0xff] }
  0xa0   :  { %466 = vadd.xlane.f32.xlu1 %v279_v25 }
  0xa1   :  { %438 = vadd.xlane.f32.xlu0 %v265_v26 }
  0xa4   :  { %342 = vadd.xlane.f32.xlu1 %v217_v31 }
  0xa5   :  { %310 = vadd.xlane.f32.xlu0 %v201_v32  ;;  %v1259_v32 = vsub.s32 %v595_v22, %v1240_v56  ;;  %v186_v22 = vld [vmem:[#allocation5 + $0x168] sm:$0xff] }
  0xa8   :  { %408 = vadd.xlane.f32.xlu1 %v250_v36 }
  0xa9   :  { %370 = vadd.xlane.f32.xlu0 %v231_v37  ;;  %v220_v37 = vmul.f32 %v171_v29, %v73_v28  ;;  %v137_v28 = vld [vmem:[#allocation3 + $0x2f0] sm:$0xff] }
  0xac   :  { %468 = vadd.xlane.f32.xlu1 %v280_v40  ;;  %v204_v40 = vmul.f32 %v155_v34, %v57_v33  ;;  %v609_v33 = vadd.s32 4294967264, %v1238_v53 }
  0xad   :  { %440 = vadd.xlane.f32.xlu0 %v266_v41  ;;  %v106_v41 = vld [vmem:[#allocation3 + $0x1f8] sm:$0xff] }
  0xae   :  { %v253_v51 = vmul.f32 %v155_v34, %v106_v41  ;;  %v187_v41 = vld [vmem:[#allocation5 + $0x170] sm:$0xff] }
  0xb0   :  { %344 = vadd.xlane.f32.xlu1 %v218_v46  ;;  %v185_v46 = vld [vmem:[#allocation5 + $0x160] sm:$0xff] }
  0xb1   :  { %312 = vadd.xlane.f32.xlu0 %v202_v48  ;;  %v234_v55 = vmul.f32 %v185_v46, %v87_v45  ;;  %v89_v45 = vld [vmem:[#allocation3 + $0x170] sm:$0xff] }
  0xb4   :  { %410 = vadd.xlane.f32.xlu1 %v251_v52 }
  0xb5   :  { %372 = vadd.xlane.f32.xlu0 %v232_v54  ;;  %v321_v60 = vpop.xlane.xlu1 %320 }
  0xb6   :  { %v289_v1 = vpop.xlane.xlu0 %288  ;;  %v696_v9 = vrot.slane %v321_v60, %v1245_v0  ;;  %v1273_v60 = vsub.s32 %v602_v47, %v1240_v56 }
  0xb7   :  { %v587_v42 = vrot.slane %v289_v1, %v1245_v0  ;;  %v283_v1 = vmul.f32 %v185_v46, %v136_v57 }
  0xb8   :  { %470 = vadd.xlane.f32.xlu1 %v281_v59 }
  0xb9   :  { %442 = vadd.xlane.f32.xlu0 %v267_v61  ;;  %v323_v6 = vpop.xlane.xlu1 %322  ;;  %v122_v61 = vld [vmem:[#allocation3 + $0x278] sm:$0xff] }
  0xba   :  { %v700_v10 = vrot.slane %v323_v6, %v1248_v2  ;;  %v291_v11 = vpop.xlane.xlu0 %290  ;;  %v74_v6 = vld [vmem:[#allocation3 + $0xf8] sm:$0xff] }
  0xbb   :  { %v592_v36 = vrot.slane %v291_v11, %v1248_v2  ;;  %v156_v11 = vld [vmem:[#allocation5 + $0x78] sm:$0xff] }
  0xbc   :  { %v701_v14 = vsel %vm593_vm0, %v700_v10, %v696_v9  ;;  %346 = vadd.xlane.f32.xlu1 %v219_v5  ;;  %v269_v5 = vmul.f32 %v171_v29, %v122_v61  ;;  %v58_v10 = vld [vmem:[#allocation3 + $0x78] sm:$0xff] }
  0xbd   :  { %314 = vadd.xlane.f32.xlu0 %v203_v7  ;;  %v389_v16 = vpop.xlane.xlu1 %388  ;;  %v594_v49 = vsel %vm593_vm0, %v592_v36, %v587_v42  ;;  %v172_v7 = vld [vmem:[#allocation5 + $0xf8] sm:$0xff]  ;;  %v284_v36 = vmul.f32 %v186_v22, %v137_v28  ;;  %v623_v28 = vadd.s32 4294967248, %v1238_v53 }
  0xbe   :  { %v862_v19 = vrot.slane %v389_v16, %v1248_v2  ;;  %v387_v20 = vpop.xlane.xlu0 %386 }
  0xbf   :  { %v858_v23 = vrot.slane %v387_v20, %v1245_v0 }
  0xc0   :  { %412 = vadd.xlane.f32.xlu1 %v252_v15 }
  0xc1   :  { %v863_v25 = vsel %vm593_vm0, %v862_v19, %v858_v23  ;;  %374 = vadd.xlane.f32.xlu0 %v233_v17  ;;  %v421_v26 = vpop.xlane.xlu1 %420  ;;  %v205_v17 = vmul.f32 %v156_v11, %v58_v10 }
  0xc2   :  { %v941_v30 = vrot.slane %v421_v26, %v1248_v2  ;;  %v419_v31 = vpop.xlane.xlu0 %418 }
  0xc3   :  { %v937_v35 = vrot.slane %v419_v31, %v1245_v0  ;;  %v123_v31 = vld [vmem:[#allocation3 + $0x280] sm:$0xff] }
  0xc4   :  { %472 = vadd.xlane.f32.xlu1 %v282_v24  ;;  %v254_v24 = vmul.f32 %v156_v11, %v107_v18 }
  0xc5   :  { %v942_v38 = vsel %vm593_vm0, %v941_v30, %v937_v35  ;;  %444 = vadd.xlane.f32.xlu0 %v268_v27  ;;  %v325_v39 = vpop.xlane.xlu1 %324  ;;  %v235_v27 = vmul.f32 %v186_v22, %v88_v21 }
  0xc6   :  { %v705_v43 = vrot.slane %v325_v39, %v1259_v32  ;;  %v293_v44 = vpop.xlane.xlu0 %292  ;;  %v270_v39 = vmul.f32 %v172_v7, %v123_v31 }
  0xc7   :  { %v599_v48 = vrot.slane %v293_v44, %v1259_v32  ;;  %v1292_v44 = vsub.s32 %v609_v33, %v1240_v56 }
  0xc8   :  { %v706_v50 = vsel %vm600_vm1, %v705_v43, %v701_v14  ;;  %348 = vadd.xlane.f32.xlu1 %v220_v37  ;;  %v221_v14 = vmul.f32 %v172_v7, %v74_v6  ;;  %v91_v6 = vld [vmem:[#allocation3 + $0x180] sm:$0xff]  ;;  %v616_v7 = vadd.s32 4294967256, %v1238_v53 }
  0xc9   :  { %v601_v52 = vsel %vm600_vm1, %v599_v48, %v594_v49  ;;  %316 = vadd.xlane.f32.xlu0 %v204_v40  ;;  %v423_v54 = vpop.xlane.xlu1 %422  ;;  %v138_v40 = vld [vmem:[#allocation3 + $0x2f8] sm:$0xff] }
  0xca   :  { %v946_v58 = vrot.slane %v423_v54, %v1259_v32  ;;  %v391_v59 = vpop.xlane.xlu0 %390  ;;  %v285_v47 = vmul.f32 %v187_v41, %v138_v40 }
  0xcb   :  { %v867_v62 = vrot.slane %v391_v59, %v1259_v32 }
  0xcc   :  { %v947_v63 = vsel %vm600_vm1, %v946_v58, %v942_v38  ;;  %414 = vadd.xlane.f32.xlu1 %v253_v51  ;;  %v139_v51 = vld [vmem:[#allocation3 + $0x300] sm:$0xff] }
  0xcd   :  { %v868_v3 = vsel %vm600_vm1, %v867_v62, %v863_v25  ;;  %376 = vadd.xlane.f32.xlu0 %v234_v55  ;;  %v327_v4 = vpop.xlane.xlu1 %326  ;;  %v90_v55 = vld [vmem:[#allocation3 + $0x178] sm:$0xff] }
  0xce   :  { %v710_v8 = vrot.slane %v327_v4, %v1273_v60  ;;  %v295_v9 = vpop.xlane.xlu0 %294 }
  0xcf   :  { %v606_v12 = vrot.slane %v295_v9, %v1273_v60 }
  0xd0   :  { %v711_v13 = vsel %vm607_vm2, %v710_v8, %v706_v50  ;;  %474 = vadd.xlane.f32.xlu1 %v283_v1  ;;  %v236_v50 = vmul.f32 %v187_v41, %v89_v45  ;;  %v140_v1 = vld [vmem:[#allocation3 + $0x308] sm:$0xff] }
  0xd1   :  { %v608_v15 = vsel %vm607_vm2, %v606_v12, %v601_v52  ;;  %446 = vadd.xlane.f32.xlu0 %v269_v5  ;;  %v355_v16 = vpop.xlane.xlu1 %354  ;;  %v188_v52 = vld [vmem:[#allocation5 + $0x178] sm:$0xff] }
  0xd2   :  { %v779_v19 = vrot.slane %v355_v16, %v1248_v2  ;;  %v353_v20 = vpop.xlane.xlu0 %352  ;;  %v286_v59 = vmul.f32 %v188_v52, %v139_v51  ;;  %v1307_v16 = vsub.s32 %v616_v7, %v1240_v56 }
  0xd3   :  { %v775_v23 = vrot.slane %v353_v20, %v1245_v0 }
  0xd4   :  { %350 = vadd.xlane.f32.xlu1 %v221_v14 }
  0xd5   :  { %v780_v25 = vsel %vm593_vm0, %v779_v19, %v775_v23  ;;  %318 = vadd.xlane.f32.xlu0 %v205_v17  ;;  %v425_v26 = vpop.xlane.xlu1 %424 }
  0xd6   :  { %v951_v29 = vrot.slane %v425_v26, %v1273_v60  ;;  %v393_v30 = vpop.xlane.xlu0 %392 }
  0xd7   :  { %v872_v34 = vrot.slane %v393_v30, %v1273_v60 }
  0xd8   :  { %v952_v35 = vsel %vm607_vm2, %v951_v29, %v947_v63  ;;  %416 = vadd.xlane.f32.xlu1 %v254_v24  ;;  %v237_v63 = vmul.f32 %v188_v52, %v90_v55 }
  0xd9   :  { %v873_v37 = vsel %vm607_vm2, %v872_v34, %v868_v3  ;;  %378 = vadd.xlane.f32.xlu0 %v235_v27  ;;  %v453_v38 = vpop.xlane.xlu1 %452  ;;  %v189_v3 = vld [vmem:[#allocation5 + $0x180] sm:$0xff] }
  0xda   :  { %v1020_v42 = vrot.slane %v453_v38, %v1248_v2  ;;  %v451_v43 = vpop.xlane.xlu0 %450  ;;  %v287_v10 = vmul.f32 %v189_v3, %v140_v1 }
  0xdb   :  { %v1016_v46 = vrot.slane %v451_v43, %v1245_v0 }
  0xdc   :  { %476 = vadd.xlane.f32.xlu1 %v284_v36  ;;  %v1323_v36 = vsub.s32 %v623_v28, %v1240_v56 }
  0xdd   :  { %v1021_v48 = vsel %vm593_vm0, %v1020_v42, %v1016_v46  ;;  %448 = vadd.xlane.f32.xlu0 %v270_v39  ;;  %v329_v49 = vpop.xlane.xlu1 %328  ;;  %vm1105_vm0 = vcmask 1041408  }
  0xde   :  { %v715_v54 = vrot.slane %v329_v49, %v1292_v44  ;;  %v297_v2 = vpop.xlane.xlu0 %296  ;;  %v630_v49 = vadd.s32 4294967240, %v1238_v53 }
  0xdf   :  { %v613_v57 = vrot.slane %v297_v2, %v1292_v44 }
  0xe0   :  { %v716_v58 = vsel %vm614_vm3, %v715_v54, %v711_v13  ;;  %478 = vadd.xlane.f32.xlu1 %v285_v47  ;;  %v238_v13 = vmul.f32 %v189_v3, %v91_v6 }
  0xe1   :  { %v615_v61 = vsel %vm614_vm3, %v613_v57, %v608_v15  ;;  %380 = vadd.xlane.f32.xlu0 %v236_v50  ;;  %v395_v62 = vpop.xlane.xlu1 %394  ;;  %v1339_v57 = vsub.s32 %v630_v49, %v1240_v56 }
  0xe2   :  { %v877_v4 = vrot.slane %v395_v62, %v1292_v44  ;;  %v357_v5 = vpop.xlane.xlu0 %356 }
  0xe3   :  { %v784_v8 = vrot.slane %v357_v5, %v1259_v32 }
  0xe4   :  { %v878_v9 = vsel %vm614_vm3, %v877_v4, %v873_v37  ;;  %480 = vadd.xlane.f32.xlu1 %v286_v59 }
  0xe5   :  { %v785_v11 = vsel %vm600_vm1, %v784_v8, %v780_v25  ;;  %382 = vadd.xlane.f32.xlu0 %v237_v63  ;;  %v455_v12 = vpop.xlane.xlu1 %454  ;;  %v637_v8 = vadd.s32 4294967232, %v1238_v53 }
  0xe6   :  { %v1025_v14 = vrot.slane %v455_v12, %v1259_v32  ;;  %v427_v15 = vpop.xlane.xlu0 %426 }
  0xe7   :  { %v956_v17 = vrot.slane %v427_v15, %v1292_v44  ;;  %v1355_v15 = vsub.s32 %v637_v8, %v1240_v56 }
  0xe8   :  { %v1026_v18 = vsel %vm600_vm1, %v1025_v14, %v1021_v48  ;;  %482 = vadd.xlane.f32.xlu1 %v287_v10  ;;  %vm1111_vm1 = vcmask 58368  }
  0xe9   :  { %v957_v19 = vsel %vm614_vm3, %v956_v17, %v952_v35  ;;  %384 = vadd.xlane.f32.xlu0 %v238_v13  ;;  %v331_v20 = vpop.xlane.xlu1 %330 }
  0xea   :  { %v720_v21 = vrot.slane %v331_v20, %v1307_v16  ;;  %v299_v22 = vpop.xlane.xlu0 %298 }
  0xeb   :  { %v620_v23 = vrot.slane %v299_v22, %v1307_v16 }
  0xec   :  { %v721_v32 = vsel %vm621_vm4, %v720_v21, %v716_v58 }
  0xed   :  { %v622_v24 = vsel %vm621_vm4, %v620_v23, %v615_v61  ;;  %v397_v25 = vpop.xlane.xlu1 %396 }
  0xee   :  { %v882_v26 = vrot.slane %v397_v25, %v1307_v16  ;;  %v359_v27 = vpop.xlane.xlu0 %358 }
  0xef   :  { %v789_v29 = vrot.slane %v359_v27, %v1273_v60  ;;  %v644_v27 = vadd.s32 4294967224, %v1238_v53 }
  0xf0   :  { %v883_v30 = vsel %vm621_vm4, %v882_v26, %v878_v9 }
  0xf1   :  { %v790_v31 = vsel %vm607_vm2, %v789_v29, %v785_v11  ;;  %v457_v33 = vpop.xlane.xlu1 %456 }
  0xf2   :  { %v1030_v34 = vrot.slane %v457_v33, %v1273_v60  ;;  %v429_v35 = vpop.xlane.xlu0 %428 }
  0xf3   :  { %v961_v37 = vrot.slane %v429_v35, %v1307_v16  ;;  %v1371_v35 = vsub.s32 %v644_v27, %v1240_v56 }
  0xf4   :  { %v1031_v38 = vsel %vm607_vm2, %v1030_v34, %v1026_v18  ;;  %vm1125_vm2 = vcmask 1024  }
  0xf5   :  { %v962_v39 = vsel %vm621_vm4, %v961_v37, %v957_v19  ;;  %v333_v40 = vpop.xlane.xlu1 %332 }
  0xf6   :  { %v725_v41 = vrot.slane %v333_v40, %v1323_v36  ;;  %v301_v42 = vpop.xlane.xlu0 %300 }
  0xf7   :  { %v627_v43 = vrot.slane %v301_v42, %v1323_v36 }
  0xf8   :  { %v726_v45 = vsel %vm628_vm5, %v725_v41, %v721_v32 }
  0xf9   :  { %v629_v60 = vsel %vm628_vm5, %v627_v43, %v622_v24  ;;  %v399_v46 = vpop.xlane.xlu1 %398 }
  0xfa   :  { %v887_v47 = vrot.slane %v399_v46, %v1323_v36  ;;  %v361_v48 = vpop.xlane.xlu0 %360 }
  0xfb   :  { %v794_v50 = vrot.slane %v361_v48, %v1292_v44  ;;  %v651_v48 = vadd.s32 4294967216, %v1238_v53 }
  0xfc   :  { %v888_v51 = vsel %vm628_vm5, %v887_v47, %v883_v30 }
  0xfd   :  { %v795_v52 = vsel %vm614_vm3, %v794_v50, %v790_v31  ;;  %v459_v54 = vpop.xlane.xlu1 %458 }
  0xfe   :  { %v1035_v2 = vrot.slane %v459_v54, %v1292_v44  ;;  %v431_v55 = vpop.xlane.xlu0 %430 }
  0xff   :  { %v966_v58 = vrot.slane %v431_v55, %v1323_v36  ;;  %v1387_v55 = vsub.s32 %v651_v48, %v1240_v56 }
 0x100   :  { %v1036_v59 = vsel %vm614_vm3, %v1035_v2, %v1031_v38 }
 0x101   :  { %v967_v61 = vsel %vm628_vm5, %v966_v58, %v962_v39  ;;  %v335_v62 = vpop.xlane.xlu1 %334 }
 0x102   :  { %v730_v63 = vrot.slane %v335_v62, %v1339_v57  ;;  %v303_v1 = vpop.xlane.xlu0 %302 }
 0x103   :  { %v634_v3 = vrot.slane %v303_v1, %v1339_v57 }
 0x104   :  { %v731_v4 = vsel %vm635_vm6, %v730_v63, %v726_v45 }
 0x105   :  { %v636_v44 = vsel %vm635_vm6, %v634_v3, %v629_v60  ;;  %v401_v5 = vpop.xlane.xlu1 %400 }
 0x106   :  { %v892_v6 = vrot.slane %v401_v5, %v1339_v57  ;;  %v363_v7 = vpop.xlane.xlu0 %362 }
 0x107   :  { %v799_v9 = vrot.slane %v363_v7, %v1307_v16 }
 0x108   :  { %v893_v10 = vsel %vm635_vm6, %v892_v6, %v888_v51 }
 0x109   :  { %v800_v11 = vsel %vm621_vm4, %v799_v9, %v795_v52  ;;  %v461_v12 = vpop.xlane.xlu1 %460 }
 0x10a   :  { %v1040_v13 = vrot.slane %v461_v12, %v1307_v16  ;;  %v433_v14 = vpop.xlane.xlu0 %432 }
 0x10b   :  { %v971_v17 = vrot.slane %v433_v14, %v1339_v57 }
 0x10c   :  { %v1041_v18 = vsel %vm621_vm4, %v1040_v13, %v1036_v59 }
 0x10d   :  { %v972_v19 = vsel %vm635_vm6, %v971_v17, %v967_v61  ;;  %v337_v20 = vpop.xlane.xlu1 %336 }
 0x10e   :  { %v735_v21 = vrot.slane %v337_v20, %v1355_v15  ;;  %v305_v22 = vpop.xlane.xlu0 %304 }
 0x10f   :  { %v641_v23 = vrot.slane %v305_v22, %v1355_v15 }
 0x110   :  { %v736_v32 = vsel %vm642_vm7, %v735_v21, %v731_v4 }
 0x111   :  { %v643_v16 = vsel %vm642_vm7, %v641_v23, %v636_v44  ;;  %v403_v24 = vpop.xlane.xlu1 %402 }
 0x112   :  { %v897_v25 = vrot.slane %v403_v24, %v1355_v15  ;;  %v365_v26 = vpop.xlane.xlu0 %364 }
 0x113   :  { %v804_v28 = vrot.slane %v365_v26, %v1323_v36 }
 0x114   :  { %v898_v29 = vsel %vm642_vm7, %v897_v25, %v893_v10 }
 0x115   :  { %v805_v30 = vsel %vm628_vm5, %v804_v28, %v800_v11  ;;  %v463_v31 = vpop.xlane.xlu1 %462 }
 0x116   :  { %v1045_v33 = vrot.slane %v463_v31, %v1323_v36  ;;  %v435_v34 = vpop.xlane.xlu0 %434 }
 0x117   :  { %v976_v37 = vrot.slane %v435_v34, %v1355_v15  ;;  %v665_v34 = vadd.s32 4294967200, %v1238_v53 }
 0x118   :  { %v1046_v38 = vsel %vm628_vm5, %v1045_v33, %v1041_v18  ;;  %v658_v33 = vadd.s32 4294967208, %v1238_v53 }
 0x119   :  { %v977_v39 = vsel %vm642_vm7, %v976_v37, %v972_v19  ;;  %v339_v40 = vpop.xlane.xlu1 %338 }
 0x11a   :  { %v740_v41 = vrot.slane %v339_v40, %v1371_v35  ;;  %v307_v42 = vpop.xlane.xlu0 %306  ;;  %v1442_v40 = vsub.s32 %v658_v33, %v1240_v56 }
 0x11b   :  { %v648_v43 = vrot.slane %v307_v42, %v1371_v35  ;;  %v686_v42 = vadd.s32 4294967176, %v1238_v53 }
 0x11c   :  { %v741_v45 = vsel %vm649_vm8, %v740_v41, %v736_v32  ;;  %v679_v41 = vadd.s32 4294967184, %v1238_v53 }
 0x11d   :  { %v650_v36 = vsel %vm649_vm8, %v648_v43, %v643_v16  ;;  %v405_v60 = vpop.xlane.xlu1 %404  ;;  %v1447_v43 = vsub.s32 %v665_v34, %v1240_v56 }
 0x11e   :  { %v902_v46 = vrot.slane %v405_v60, %v1371_v35  ;;  %v367_v47 = vpop.xlane.xlu0 %366 }
 0x11f   :  { %v809_v49 = vrot.slane %v367_v47, %v1339_v57 }
 0x120   :  { %v903_v50 = vsel %vm649_vm8, %v902_v46, %v898_v29 }
 0x121   :  { %v810_v51 = vsel %vm635_vm6, %v809_v49, %v805_v30  ;;  %v465_v52 = vpop.xlane.xlu1 %464 }
 0x122   :  { %v1050_v54 = vrot.slane %v465_v52, %v1339_v57  ;;  %v437_v2 = vpop.xlane.xlu0 %436 }
 0x123   :  { %v981_v58 = vrot.slane %v437_v2, %v1371_v35 }
 0x124   :  { %v1391_v59 = vsel %vm635_vm6, %v1050_v54, %v1046_v38  ;;  %v672_v38 = vadd.s32 4294967192, %v1238_v53  ;;  %v1460_v53 = vsub.s32 %v679_v41, %v1240_v56 }
 0x125   :  { %v1394_v61 = vsel %vm649_vm8, %v981_v58, %v977_v39  ;;  %v341_v62 = vpop.xlane.xlu1 %340 }
 0x126   :  { %v745_v63 = vrot.slane %v341_v62, %v1387_v55  ;;  %v309_v1 = vpop.xlane.xlu0 %308  ;;  %v1454_v46 = vsub.s32 %v672_v38, %v1240_v56 }
 0x127   :  { %v655_v3 = vrot.slane %v309_v1, %v1387_v55 }
 0x128   :  { %v1399_v57 = vsel %vm656_vm9, %v745_v63, %v741_v45 }
 0x129   :  { %v1402_v4 = vsel %vm656_vm9, %v655_v3, %v650_v36  ;;  %v407_v44 = vpop.xlane.xlu1 %406 }
 0x12a   :  { %v907_v5 = vrot.slane %v407_v44, %v1387_v55  ;;  %v369_v6 = vpop.xlane.xlu0 %368 }
 0x12b   :  { %v814_v7 = vrot.slane %v369_v6, %v1355_v15 }
 0x12c   :  { %v908_v8 = vsel %vm656_vm9, %v907_v5, %v903_v50 }
 0x12d   :  { %v1408_v9 = vsel %vm642_vm7, %v814_v7, %v810_v51  ;;  %v467_v10 = vpop.xlane.xlu1 %466 }
 0x12e   :  { %v439_v11 = vpop.xlane.xlu0 %438  ;;  %v1055_v36 = vrot.slane %v467_v10, %v1355_v15  ;;  %v1464_v15 = vsub.s32 %v686_v42, %v1240_v56 }
 0x12f   :  { %v986_v60 = vrot.slane %v439_v11, %v1387_v55 }
 0x130   :  { %v1056_v54 = vsel %vm642_vm7, %v1055_v36, %v1391_v59 }
 0x131   :  { %v1410_v12 = vpop.xlane.xlu1 %342  ;;  %v987_v2 = vsel %vm656_vm9, %v986_v60, %v1394_v61 }
 0x132   :  { %v311_v13 = vpop.xlane.xlu0 %310  ;;  %v750_v56 = vrot.slane %v1410_v12, %v1442_v40 }
 0x133   :  { %v662_v48 = vrot.slane %v311_v13, %v1442_v40 }
 0x135   :  { %v409_v14 = vpop.xlane.xlu1 %408  ;;  %v664_v1 = vsel %vm663_vm10, %v662_v48, %v1402_v4 }
 0x136   :  { %v1412_v17 = vpop.xlane.xlu0 %370  ;;  %v912_v49 = vrot.slane %v409_v14, %v1442_v40 }
 0x137   :  { %v819_v61 = vrot.slane %v1412_v17, %v1371_v35 }
 0x138   :  { %v913_v59 = vsel %vm663_vm10, %v912_v49, %v908_v8 }
 0x139   :  { %v1414_v18 = vpop.xlane.xlu1 %468 }
 0x13a   :  { %v1416_v19 = vpop.xlane.xlu0 %440  ;;  %v1060_v5 = vrot.slane %v1414_v18, %v1371_v35 }
 0x13b   :  { %v991_v7 = vrot.slane %v1416_v19, %v1442_v40 }
 0x13d   :  { %v1418_v20 = vpop.xlane.xlu1 %344 }
 0x13e   :  { %v313_v21 = vpop.xlane.xlu0 %312  ;;  %v755_v4 = vrot.slane %v1418_v20, %v1447_v43 }
 0x13f   :  { %v669_v50 = vrot.slane %v313_v21, %v1447_v43 }
 0x141   :  { %v411_v22 = vpop.xlane.xlu1 %410  ;;  %v671_v10 = vsel %vm670_vm11, %v669_v50, %v664_v1 }
 0x142   :  { %v1420_v23 = vpop.xlane.xlu0 %372  ;;  %v917_v51 = vrot.slane %v411_v22, %v1447_v43 }
 0x143   :  { %v824_v48 = vrot.slane %v1420_v23, %v1387_v55 }
 0x144   :  { %v918_v11 = vsel %vm670_vm11, %v917_v51, %v913_v59 }
 0x145   :  { %v1422_v32 = vpop.xlane.xlu1 %470 }
 0x146   :  { %v1424_v16 = vpop.xlane.xlu0 %442  ;;  %v1065_v38 = vrot.slane %v1422_v32, %v1387_v55 }
 0x147   :  { %v996_v12 = vrot.slane %v1424_v16, %v1447_v43 }
 0x149   :  { %v1426_v24 = vpop.xlane.xlu1 %346 }
 0x14a   :  { %v315_v25 = vpop.xlane.xlu0 %314  ;;  %v760_v18 = vrot.slane %v1426_v24, %v1454_v46  ;;  %v751_v24 = vsel %vm663_vm10, %v750_v56, %v1399_v57  ;;  %v1061_v57 = vsel %vm649_vm8, %v1060_v5, %v1056_v54 }
 0x14b   :  { %v676_v58 = vrot.slane %v315_v25, %v1454_v46  ;;  %v1066_v55 = vsel %vm656_vm9, %v1065_v38, %v1061_v57 }
 0x14d   :  { %v413_v26 = vpop.xlane.xlu1 %412  ;;  %v678_v13 = vsel %vm677_vm12, %v676_v58, %v671_v10 }
 0x14e   :  { %v1428_v27 = vpop.xlane.xlu0 %374  ;;  %v922_v62 = vrot.slane %v413_v26, %v1454_v46 }
 0x14f   :  { %v829_v50 = vrot.slane %v1428_v27, %v1442_v40 }
 0x150   :  { %v923_v35 = vsel %vm677_vm12, %v922_v62, %v918_v11 }
 0x151   :  { %v1430_v28 = vpop.xlane.xlu1 %472 }
 0x152   :  { %v1432_v29 = vpop.xlane.xlu0 %444 }
 0x153   :  { %v1001_v19 = vrot.slane %v1432_v29, %v1454_v46 }
 0x155   :  { %v1434_v30 = vpop.xlane.xlu1 %348 }
 0x156   :  { %v317_v31 = vpop.xlane.xlu0 %316  ;;  %v765_v22 = vrot.slane %v1434_v30, %v1460_v53  ;;  %v820_v30 = vsel %vm649_vm8, %v819_v61, %v1408_v9  ;;  %v1070_v9 = vrot.slane %v1430_v28, %v1442_v40 }
 0x157   :  { %v683_v3 = vrot.slane %v317_v31, %v1460_v53  ;;  %v992_v31 = vsel %vm663_vm10, %v991_v7, %v987_v2  ;;  %v825_v56 = vsel %vm656_vm9, %v824_v48, %v820_v30 }
 0x158   :  { %v997_v41 = vsel %vm670_vm11, %v996_v12, %v992_v31  ;;  %v1071_v1 = vsel %vm663_vm10, %v1070_v9, %v1066_v55 }
 0x159   :  { %v415_v37 = vpop.xlane.xlu1 %414  ;;  %v685_v20 = vsel %vm684_vm13, %v683_v3, %v678_v13  ;;  %v1002_v60 = vsel %vm677_vm12, %v1001_v19, %v997_v41 }
 0x15a   :  { %v1439_v39 = vpop.xlane.xlu0 %376  ;;  %v927_v44 = vrot.slane %v415_v37, %v1460_v53  ;;  %v756_v37 = vsel %vm670_vm11, %v755_v4, %v751_v24 }
 0x15b   :  { %v761_v36 = vsel %vm677_vm12, %v760_v18, %v756_v37  ;;  %v834_v23 = vrot.slane %v1439_v39, %v1447_v43 }
 0x15c   :  { %v928_v21 = vsel %vm684_vm13, %v927_v44, %v923_v35  ;;  %v766_v49 = vsel %vm684_vm13, %v765_v22, %v761_v36  ;;  %v1117_v22 = vstv %s1572_s2 }
 0x15d   :  { %v1449_v45 = vpop.xlane.xlu1 %474 }
 0x15e   :  { %v1456_v47 = vpop.xlane.xlu0 %446  ;;  %v1075_v51 = vrot.slane %v1449_v45, %v1447_v43  ;;  %v830_v43 = vsel %vm663_vm10, %v829_v50, %v825_v56 }
 0x15f   :  { %v1006_v16 = vrot.slane %v1456_v47, %v1460_v53  ;;  %v835_v61 = vsel %vm670_vm11, %v834_v23, %v830_v43 }
 0x160   :  { %v1076_v44 = vsel %vm670_vm11, %v1075_v51, %v1071_v1 }
 0x161   :  { %v351_v52 = vpop.xlane.xlu1 %350  ;;  %v1007_v32 = vsel %vm684_vm13, %v1006_v16, %v1002_v60 }
 0x162   :  { %v319_v63 = vpop.xlane.xlu0 %318  ;;  %v770_v29 = vrot.slane %v351_v52, %v1464_v15 }
 0x163   :  { %v690_v6 = vrot.slane %v319_v63, %v1464_v15 }
 0x164   :  { %v771_v52 = vsel %vm691_vm14, %v770_v29, %v766_v49 }
 0x165   :  { %v417_v8 = vpop.xlane.xlu1 %416  ;;  %v692_v25 = vsel %vm691_vm14, %v690_v6, %v685_v20 }
 0x166   :  { %v932_v14 = vrot.slane %v417_v8, %v1464_v15  ;;  %v379_v17 = vpop.xlane.xlu0 %378 }
 0x167   :  { %v839_v40 = vrot.slane %v379_v17, %v1454_v46 }
 0x168   :  { %v933_v26 = vsel %vm691_vm14, %v932_v14, %v928_v21 }
 0x169   :  { %v1097_v33 = vsel %vm1096_vm15, %v933_v26, %v692_v25  ;;  %v477_v34 = vpop.xlane.xlu1 %476  ;;  %v840_v7 = vsel %vm677_vm12, %v839_v40, %v835_v61 }
 0x16a   :  { %v449_v42 = vpop.xlane.xlu0 %448  ;;  %v1080_v28 = vrot.slane %v477_v34, %v1454_v46  ;;  %v1106_v27 = vsel %vm1105_vm0, %v1097_v33, 0.0 }
 0x16b   :  { %v1011_v47 = vrot.slane %v449_v42, %v1464_v15 }
 0x16c   :  { %v1081_v46 = vsel %vm677_vm12, %v1080_v28, %v1076_v44 }
 0x16d   :  { %v1012_v54 = vsel %vm691_vm14, %v1011_v47, %v1007_v32  ;;  %v479_v2 = vpop.xlane.xlu1 %478 }
 0x16e   :  { %v1098_v58 = vsel %vm1096_vm15, %v1012_v54, %v771_v52  ;;  %v381_v62 = vpop.xlane.xlu0 %380  ;;  %v1085_v63 = vrot.slane %v479_v2, %v1460_v53 }
 0x16f   :  { %v1107_v45 = vsel %vm1105_vm0, %v1098_v58, 0.0  ;;  %v844_v3 = vrot.slane %v381_v62, %v1460_v53 }
 0x170   :  { %v1108_v39 = vadd.f32 %v1107_v45, %v1106_v27  ;;  %v1086_v4 = vsel %vm684_vm13, %v1085_v63, %v1081_v46 }
 0x171   :  { %v481_v59 = vpop.xlane.xlu1 %480  ;;  %v845_v53 = vsel %vm684_vm13, %v844_v3, %v840_v7 }
 0x172   :  { %v1090_v5 = vrot.slane %v481_v59, %v1464_v15  ;;  %v383_v6 = vpop.xlane.xlu0 %382 }
 0x173   :  { %v849_v10 = vrot.slane %v383_v6, %v1464_v15 }
 0x174   :  { %v1091_v11 = vsel %vm691_vm14, %v1090_v5, %v1086_v4 }
 0x175   :  { %v850_v8 = vsel %vm691_vm14, %v849_v10, %v845_v53  ;;  %v483_v12 = vpop.xlane.xlu1 %482 }
 0x176   :  { %v1099_v13 = vsel %vm1096_vm15, %v1091_v11, %v850_v8  ;;  %v1095_v35 = vrot.slane %v483_v12, %v1245_v0  ;;  %v385_v14 = vpop.xlane.xlu0 %384 }
 0x177   :  { %v854_v17 = vrot.slane %v385_v14, %v1245_v0  ;;  %v1109_v18 = vsel %vm1105_vm0, %v1099_v13, 0.0 }
 0x178   :  { %v1110_v19 = vadd.f32 %v1109_v18, %v1108_v39 }
 0x179   :  { %v1100_v15 = vsel %vm1096_vm15, %v1095_v35, %v854_v17 }
 0x17a   :  { %v1112_v20 = vsel %vm1111_vm1, %v1100_v15, 0.0 }
 0x17b   :  { %v1113_v21 = vadd.f32 %v1112_v20, %v1110_v19 }
 0x17d   :  { %1114 = vadd.xlane.f32.xlu0 %v1113_v21 }
 0x20a   :  { %v1115_v16 = vpop.xlane.xlu0 %1114 }
 0x20b   :  { %v1118_v25 = vadd.f32 %v1117_v22, %v1115_v16 }
 0x20d   :  { %v1133_v26 = vmul.f32 -1.442695, %v1118_v25 }
 0x20f   :  { %1138 = vpow2.f32 %v1133_v26 }
 0x219   :  { %v1139_v24 = vpop.eup %1138 }
 0x21a   :  { %v1122_v31 = vadd.f32 1.0, %v1139_v24 }
 0x21c   :  { %1140 = vrcp.f32 %v1122_v31 }
 0x226   :  { %v1141_v0 = vpop.eup %1140 }
 0x227   :  { %1126 = vst.msk [vmem:[%s1573_s3] sm:$0x3] %vm1125_vm2, %v1141_v0 }
 0x228   :  { %1131 = vsyncpa [#allocation4], 1 }
 0x229   :  { %1132 = vsyncpa [#allocation6], 1 }

</bundles_post_ra>
